<compile_context>
chip_gen: v5e
topology: v5e:2x2
jax: 0.10.0
libtpu: 0.0.40
codegen_flags: <defaults>
</compile_context>

<pallas_src>
import functools

import jax
import jax.numpy as jnp
from jax.experimental import pallas as pl
from jax.experimental.pallas import tpu as pltpu


def _round_up(a, m):
    return ((a + m - 1) // m) * m


def _xy_set_encoder_kernel(x_ref, y_ref, w0x_ref, w0y_ref, b0_ref,
                           w1_ref, b1_ref, w2_ref, b2_ref,
                           out_ref, acc_ref, *, n_points, mask_set):
    # Grid: (batch tiles, set tiles).  x_ref: (tile_b, tile_n, x_dim) bf16,
    # weights bf16, biases f32, out_ref: (tile_b, hidden_pad) f32,
    # acc_ref: (tile_b, hidden_pad) f32 scratch (per-batch-tile set sum).
    j = pl.program_id(1)

    @pl.when(j == 0)
    def _():
        acc_ref[...] = jnp.zeros_like(acc_ref)

    tile_b, tile_n, x_dim = x_ref.shape
    y_dim = y_ref.shape[-1]
    rows = tile_b * tile_n

    # Layout no-op reshapes (tile_n is a multiple of 16): every matmul is 2-D.
    x2 = x_ref[...].reshape(rows, x_dim)
    y2 = y_ref[...].reshape(rows, y_dim)

    # Layer 0: concat(x, y) @ w0 + b0 == x @ w0[:x_dim] + y @ w0[x_dim:] + b0
    h = (jnp.dot(x2, w0x_ref[...], preferred_element_type=jnp.float32)
         + jnp.dot(y2, w0y_ref[...], preferred_element_type=jnp.float32)
         + b0_ref[...])
    h = jnp.maximum(h, 0.0)

    # Hidden layer: Linear(hidden -> hidden) + ReLU (bf16 operands, f32 acc).
    h = jnp.dot(h.astype(jnp.bfloat16), w1_ref[...],
                preferred_element_type=jnp.float32) + b1_ref[...]
    h = jnp.maximum(h, 0.0)

    # Partial set-sum for this (batch tile, set tile): XLU/VPU reduction, no
    # MXU FLOPs.  Padded set rows (set index >= n_points) are masked out.
    h3 = h.reshape(tile_b, tile_n, h.shape[-1])
    if mask_set:
        set_idx = jax.lax.broadcasted_iota(jnp.int32, h3.shape, 1) + j * tile_n
        h3 = jnp.where(set_idx < n_points, h3, 0.0)
    acc_ref[...] += jnp.sum(h3, axis=1)

    # Last set tile: mean (1/N) commutes with the final affine layer, so the
    # output matmul only has tile_b rows.
    @pl.when(j == pl.num_programs(1) - 1)
    def _():
        hm = acc_ref[...] * jnp.float32(1.0 / n_points)
        out_ref[...] = (jnp.dot(hm.astype(jnp.bfloat16), w2_ref[...],
                                preferred_element_type=jnp.float32)
                        + b2_ref[...])


def _choose_tiling(B, N, hidden_pad, in_dim):
    """Pick (tile_b, tile_n).

    * tile_n is a multiple of 16 so the in-kernel reshapes between
      (tile_b*tile_n, d) and (tile_b, tile_n, d) are layout no-ops for both
      bf16 inputs and f32 activations.
    * With more than one batch tile, tile_b is a multiple of 8 so the
      (tile_b, hidden_pad) output block satisfies the (8, 128) block rule.
    * Rows per step target ~2048 (amortizes the ~0.35 us/step overhead),
      bounded by a VMEM budget so we stay well inside v7x's 64 MiB.
    """
    GR = 16
    N_pad = _round_up(max(N, 1), GR)
    # ~4 live f32 copies of the (rows, hidden_pad) activation slab plus the
    # double-buffered bf16 x/y blocks.
    bytes_per_row = hidden_pad * 4 * 4 + in_dim * 2 * 2
    max_rows = max(GR, (((24 << 20) // bytes_per_row) // GR) * GR)
    target_rows = min(2048, max_rows)

    if B <= 8:
        tile_b = B                                  # single batch tile is legal
    else:
        by_rows = max(8, ((max(1, target_rows // N_pad)) // 8) * 8)
        by_cores = _round_up((B + 1) // 2, 8)       # >= 2 tiles for v7x megacore
        tile_b = min(by_rows, by_cores)

    if tile_b * N_pad <= target_rows:
        tile_n = N_pad                              # whole (padded) set per step
    else:
        per_b = max(GR, ((target_rows // tile_b) // GR) * GR)
        n_set_tiles = -(-N_pad // per_b)
        tile_n = _round_up(-(-N_pad // n_set_tiles), GR)
    return tile_b, tile_n


def xy_set_encoder(x, y, params):
    """x: (B, N, x_dim), y: (B, N, y_dim) -> (B, 1, hidden_dim)."""
    B, N, x_dim = x.shape
    y_dim = y.shape[-1]
    if N == 0:
        # PyTorch quirk: empty set returns zeros of shape (B, 1, x_dim) in the
        # input dtype (shape/dtype differ from the main path on purpose).
        return jnp.zeros((B, 1, x_dim), dtype=x.dtype)

    w0, b0, w1, b1, w2, b2 = params
    hidden = w2.shape[1]
    hidden_pad = _round_up(hidden, 128)   # lane-dense matmuls and output stores

    def pad2(a, r, c):
        return jnp.pad(a, ((0, r - a.shape[0]), (0, c - a.shape[1])))

    # Split the first-layer weight (no concatenated xy tensor ever hits HBM),
    # zero-pad hidden axes to 128 (exact: padded lanes stay 0 through ReLU),
    # and cast matmul operands to bf16 (f32 accumulation in the kernel).
    w0x = pad2(w0[:x_dim], x_dim, hidden_pad).astype(jnp.bfloat16)
    w0y = pad2(w0[x_dim:], y_dim, hidden_pad).astype(jnp.bfloat16)
    w1p = pad2(w1, hidden_pad, hidden_pad).astype(jnp.bfloat16)
    w2p = pad2(w2, hidden_pad, hidden_pad).astype(jnp.bfloat16)
    b0p = pad2(b0, 1, hidden_pad).astype(jnp.float32)
    b1p = pad2(b1, 1, hidden_pad).astype(jnp.float32)
    b2p = pad2(b2, 1, hidden_pad).astype(jnp.float32)

    tile_b, tile_n = _choose_tiling(B, N, hidden_pad, x_dim + y_dim)
    B_pad = _round_up(B, tile_b)
    N_tot = _round_up(N, tile_n)

    xb = x.astype(jnp.bfloat16)
    yb = y.astype(jnp.bfloat16)
    if B_pad != B or N_tot != N:
        pad3 = ((0, B_pad - B), (0, N_tot - N), (0, 0))
        xb = jnp.pad(xb, pad3)
        yb = jnp.pad(yb, pad3)

    n_b = B_pad // tile_b
    n_n = N_tot // tile_n
    const = lambda i, j: (0, 0)
    single = pl.Buffered(1)   # constant blocks: DMA'd once, no double buffer
    kern = functools.partial(_xy_set_encoder_kernel,
                             n_points=N, mask_set=(N_tot != N))

    out2d = pl.pallas_call(
        kern,
        out_shape=jax.ShapeDtypeStruct((B_pad, hidden_pad), jnp.float32),
        grid_spec=pltpu.PrefetchScalarGridSpec(
            num_scalar_prefetch=0,
            grid=(n_b, n_n),
            in_specs=[
                pl.BlockSpec((tile_b, tile_n, x_dim), lambda i, j: (i, j, 0)),
                pl.BlockSpec((tile_b, tile_n, y_dim), lambda i, j: (i, j, 0)),
                pl.BlockSpec((x_dim, hidden_pad), const, pipeline_mode=single),
                pl.BlockSpec((y_dim, hidden_pad), const, pipeline_mode=single),
                pl.BlockSpec((1, hidden_pad), const, pipeline_mode=single),
                pl.BlockSpec((hidden_pad, hidden_pad), const, pipeline_mode=single),
                pl.BlockSpec((1, hidden_pad), const, pipeline_mode=single),
                pl.BlockSpec((hidden_pad, hidden_pad), const, pipeline_mode=single),
                pl.BlockSpec((1, hidden_pad), const, pipeline_mode=single),
            ],
            out_specs=pl.BlockSpec((tile_b, hidden_pad), lambda i, j: (i, 0)),
            scratch_shapes=[pltpu.VMEM((tile_b, hidden_pad), jnp.float32)],
        ),
        compiler_params=pltpu.CompilerParams(
            dimension_semantics=("parallel", "arbitrary"),
            vmem_limit_bytes=64 * 1024 * 1024),
    )(xb, yb, w0x, w0y, b0p, w1p, b1p, w2p, b2p)

    return out2d[:B, :hidden].reshape(B, 1, hidden)


def init_params(key, x_dim, y_dim, hidden_dim):
    """Deterministic init for phi: Linear(in,h) - ReLU - Linear(h,h) - ReLU - Linear(h,h)."""
    in_dim = x_dim + y_dim
    k0, k1, k2, k3, k4, k5 = jax.random.split(key, 6)
    s0 = 1.0 / jnp.sqrt(in_dim)
    s1 = 1.0 / jnp.sqrt(hidden_dim)
    w0 = jax.random.uniform(k0, (in_dim, hidden_dim), jnp.float32, -s0, s0)
    b0 = jax.random.uniform(k1, (1, hidden_dim), jnp.float32, -s0, s0)
    w1 = jax.random.uniform(k2, (hidden_dim, hidden_dim), jnp.float32, -s1, s1)
    b1 = jax.random.uniform(k3, (1, hidden_dim), jnp.float32, -s1, s1)
    w2 = jax.random.uniform(k4, (hidden_dim, hidden_dim), jnp.float32, -s1, s1)
    b2 = jax.random.uniform(k5, (1, hidden_dim), jnp.float32, -s1, s1)
    return (w0, b0, w1, b1, w2, b2)


def _reference(x, y, params):
    """Pure-JAX f32 reference for correctness check."""
    w0, b0, w1, b1, w2, b2 = params
    xy = jnp.concatenate([x, y], axis=-1)
    h = jnp.maximum(xy @ w0 + b0, 0.0)
    h = jnp.maximum(h @ w1 + b1, 0.0)
    h = h @ w2 + b2
    return jnp.mean(h, axis=1, keepdims=True)


if __name__ == "__main__":
    # Small shapes consistent with the module's forward.
    B, N = 2, 8
    x_dim, y_dim, hidden_dim = 4, 2, 32

    key = jax.random.PRNGKey(0)
    kx, ky, kp = jax.random.split(key, 3)
    x = jax.random.normal(kx, (B, N, x_dim), jnp.float32)
    y = jax.random.normal(ky, (B, N, y_dim), jnp.float32)
    params = init_params(kp, x_dim, y_dim, hidden_dim)

    out = xy_set_encoder(x, y, params)
    out = jax.block_until_ready(out)

    ref = _reference(x, y, params)
    assert out.shape == (B, 1, hidden_dim), out.shape
    # bf16 matmul operands => looser tolerance than the pure-f32 version.
    assert jnp.allclose(out, ref, atol=3e-2, rtol=3e-2), "mismatch vs reference"

    print("KERNEL_OK")
</pallas_src>

<mosaic_0001>
module attributes {stable_mosaic.version = 11 : i64} {
  func.func @_xy_set_encoder_kernel(%arg0: i32, %arg1: i32, %arg2: memref<2x16x4xbf16, #tpu.memory_space<vmem>>, %arg3: memref<2x16x2xbf16, #tpu.memory_space<vmem>>, %arg4: memref<4x128xbf16, #tpu.memory_space<vmem>>, %arg5: memref<2x128xbf16, #tpu.memory_space<vmem>>, %arg6: memref<1x128xf32, #tpu.memory_space<vmem>>, %arg7: memref<128x128xbf16, #tpu.memory_space<vmem>>, %arg8: memref<1x128xf32, #tpu.memory_space<vmem>>, %arg9: memref<128x128xbf16, #tpu.memory_space<vmem>>, %arg10: memref<1x128xf32, #tpu.memory_space<vmem>>, %arg11: memref<2x128xf32, #tpu.memory_space<vmem>>, %arg12: memref<2x128xf32, #tpu.memory_space<vmem>>) attributes {dimension_semantics = [#tpu.dimension_semantics<parallel>, #tpu.dimension_semantics<arbitrary>], iteration_bounds = array<i64: 1, 1>, scalar_prefetch = 0 : i64, scratch_operands = 1 : i64, tpu.core_type = #tpu.core_type<tc>, window_params = [{transform_indices = @transform_0, window_bounds = array<i64: 2, 16, 4>}, {transform_indices = @transform_1, window_bounds = array<i64: 2, 16, 2>}, {pipeline_mode = #tpu.pipeline_mode<synchronous>, transform_indices = @transform_2, window_bounds = array<i64: 4, 128>}, {pipeline_mode = #tpu.pipeline_mode<synchronous>, transform_indices = @transform_3, window_bounds = array<i64: 2, 128>}, {pipeline_mode = #tpu.pipeline_mode<synchronous>, transform_indices = @transform_4, window_bounds = array<i64: 1, 128>}, {pipeline_mode = #tpu.pipeline_mode<synchronous>, transform_indices = @transform_5, window_bounds = array<i64: 128, 128>}, {pipeline_mode = #tpu.pipeline_mode<synchronous>, transform_indices = @transform_6, window_bounds = array<i64: 1, 128>}, {pipeline_mode = #tpu.pipeline_mode<synchronous>, transform_indices = @transform_7, window_bounds = array<i64: 128, 128>}, {pipeline_mode = #tpu.pipeline_mode<synchronous>, transform_indices = @transform_8, window_bounds = array<i64: 1, 128>}, {transform_indices = @transform_9, window_bounds = array<i64: 2, 128>}]} {
    %c0_i32 = arith.constant 0 : i32
    %0 = arith.cmpi eq, %arg1, %c0_i32 : i32
    %1 = arith.extui %0 : i1 to i32
    %c0_i32_0 = arith.constant 0 : i32
    %2 = arith.cmpi ne, %1, %c0_i32_0 : i32
    scf.if %2 {
      %cst_28 = arith.constant 0.000000e+00 : f32
      %41 = vector.broadcast %cst_28 : f32 to vector<2x128xf32>
      %c0_29 = arith.constant 0 : index
      %c0_30 = arith.constant 0 : index
      %42 = vector.load %arg12[%c0_29, %c0_30] : memref<2x128xf32, #tpu.memory_space<vmem>>, vector<2x128xf32>
      tpu.vector_store %arg12[%c0_29, %c0_30], %41 {strides = array<i32>} : memref<2x128xf32, #tpu.memory_space<vmem>>, vector<2x128xf32>,
    } else {
    }
    %c0 = arith.constant 0 : index
    %c0_1 = arith.constant 0 : index
    %c0_2 = arith.constant 0 : index
    %3 = vector.load %arg2[%c0, %c0_1, %c0_2] : memref<2x16x4xbf16, #tpu.memory_space<vmem>>, vector<2x16x4xbf16>
    %4 = vector.shape_cast %3 : vector<2x16x4xbf16> to vector<32x4xbf16>
    %c0_3 = arith.constant 0 : index
    %c0_4 = arith.constant 0 : index
    %c0_5 = arith.constant 0 : index
    %5 = vector.load %arg3[%c0_3, %c0_4, %c0_5] : memref<2x16x2xbf16, #tpu.memory_space<vmem>>, vector<2x16x2xbf16>
    %6 = vector.shape_cast %5 : vector<2x16x2xbf16> to vector<32x2xbf16>
    %c0_6 = arith.constant 0 : index
    %c0_7 = arith.constant 0 : index
    %7 = vector.load %arg4[%c0_6, %c0_7] : memref<4x128xbf16, #tpu.memory_space<vmem>>, vector<4x128xbf16>
    %cst = arith.constant dense<0.000000e+00> : vector<32x128xf32>
    %8 = tpu.matmul %4, %7, %cst {dimension_numbers = #tpu.dot_dimension_numbers<[1], [0], [0], [1], [0, 0, 1, 1], [], []>} : vector<32x4xbf16>, vector<4x128xbf16>, vector<32x128xf32> -> vector<32x128xf32>
    %c0_8 = arith.constant 0 : index
    %c0_9 = arith.constant 0 : index
    %9 = vector.load %arg5[%c0_8, %c0_9] : memref<2x128xbf16, #tpu.memory_space<vmem>>, vector<2x128xbf16>
    %cst_10 = arith.constant dense<0.000000e+00> : vector<32x128xf32>
    %10 = tpu.matmul %6, %9, %cst_10 {dimension_numbers = #tpu.dot_dimension_numbers<[1], [0], [0], [1], [0, 0, 1, 1], [], []>} : vector<32x2xbf16>, vector<2x128xbf16>, vector<32x128xf32> -> vector<32x128xf32>
    %11 = arith.addf %8, %10 : vector<32x128xf32>
    %c0_11 = arith.constant 0 : index
    %c0_12 = arith.constant 0 : index
    %12 = vector.load %arg6[%c0_11, %c0_12] : memref<1x128xf32, #tpu.memory_space<vmem>>, vector<1x128xf32>
    %13 = vector.broadcast %12 : vector<1x128xf32> to vector<32x128xf32>
    %14 = arith.addf %11, %13 : vector<32x128xf32>
    %cst_13 = arith.constant 0.000000e+00 : f32
    %15 = vector.broadcast %cst_13 : f32 to vector<32x128xf32>
    %16 = arith.maximumf %14, %15 : vector<32x128xf32>
    %17 = arith.truncf %16 : vector<32x128xf32> to vector<32x128xbf16>
    %c0_14 = arith.constant 0 : index
    %c0_15 = arith.constant 0 : index
    %18 = vector.load %arg7[%c0_14, %c0_15] : memref<128x128xbf16, #tpu.memory_space<vmem>>, vector<128x128xbf16>
    %cst_16 = arith.constant dense<0.000000e+00> : vector<32x128xf32>
    %19 = tpu.matmul %17, %18, %cst_16 {dimension_numbers = #tpu.dot_dimension_numbers<[1], [0], [0], [1], [0, 0, 1, 1], [], []>} : vector<32x128xbf16>, vector<128x128xbf16>, vector<32x128xf32> -> vector<32x128xf32>
    %c0_17 = arith.constant 0 : index
    %c0_18 = arith.constant 0 : index
    %20 = vector.load %arg8[%c0_17, %c0_18] : memref<1x128xf32, #tpu.memory_space<vmem>>, vector<1x128xf32>
    %21 = vector.broadcast %20 : vector<1x128xf32> to vector<32x128xf32>
    %22 = arith.addf %19, %21 : vector<32x128xf32>
    %cst_19 = arith.constant 0.000000e+00 : f32
    %23 = vector.broadcast %cst_19 : f32 to vector<32x128xf32>
    %24 = arith.maximumf %22, %23 : vector<32x128xf32>
    %25 = vector.shape_cast %24 : vector<32x128xf32> to vector<2x16x128xf32>
    %26 = tpu.iota {dimensions = array<i32: 1>} : vector<2x16x128xi32>
    %c16_i32 = arith.constant 16 : i32
    %27 = arith.muli %arg1, %c16_i32 : i32
    %28 = vector.broadcast %27 : i32 to vector<2x16x128xi32>
    %29 = arith.addi %26, %28 : vector<2x16x128xi32>
    %c8_i32 = arith.constant 8 : i32
    %30 = vector.broadcast %c8_i32 : i32 to vector<2x16x128xi32>
    %31 = arith.cmpi slt, %29, %30 : vector<2x16x128xi32>
    %cst_20 = arith.constant 0.000000e+00 : f32
    %32 = vector.broadcast %cst_20 : f32 to vector<2x16x128xf32>
    %33 = arith.select %31, %25, %32 : vector<2x16x128xi1>, vector<2x16x128xf32>
    %c0_21 = arith.constant 0 : index
    %c0_22 = arith.constant 0 : index
    %34 = vector.load %arg12[%c0_21, %c0_22] : memref<2x128xf32, #tpu.memory_space<vmem>>, vector<2x128xf32>
    %cst_23 = arith.constant dense<0.000000e+00> : vector<2x128xf32>
    %35 = vector.multi_reduction <add>, %33, %cst_23 [1] : vector<2x16x128xf32> to vector<2x128xf32>
    %36 = arith.addf %34, %35 : vector<2x128xf32>
    %c0_24 = arith.constant 0 : index
    %c0_25 = arith.constant 0 : index
    %37 = vector.load %arg12[%c0_24, %c0_25] : memref<2x128xf32, #tpu.memory_space<vmem>>, vector<2x128xf32>
    tpu.vector_store %arg12[%c0_24, %c0_25], %36 {strides = array<i32>} : memref<2x128xf32, #tpu.memory_space<vmem>>, vector<2x128xf32>,
    %c0_i32_26 = arith.constant 0 : i32
    %38 = arith.cmpi eq, %arg1, %c0_i32_26 : i32
    %39 = arith.extui %38 : i1 to i32
    %c0_i32_27 = arith.constant 0 : i32
    %40 = arith.cmpi ne, %39, %c0_i32_27 : i32
    scf.if %40 {
      %c0_28 = arith.constant 0 : index
      %c0_29 = arith.constant 0 : index
      %41 = vector.load %arg12[%c0_28, %c0_29] : memref<2x128xf32, #tpu.memory_space<vmem>>, vector<2x128xf32>
      %cst_30 = arith.constant 1.250000e-01 : f32
      %42 = vector.broadcast %cst_30 : f32 to vector<2x128xf32>
      %43 = arith.mulf %41, %42 : vector<2x128xf32>
      %44 = arith.truncf %43 : vector<2x128xf32> to vector<2x128xbf16>
      %c0_31 = arith.constant 0 : index
      %c0_32 = arith.constant 0 : index
      %45 = vector.load %arg9[%c0_31, %c0_32] : memref<128x128xbf16, #tpu.memory_space<vmem>>, vector<128x128xbf16>
      %cst_33 = arith.constant dense<0.000000e+00> : vector<2x128xf32>
      %46 = tpu.matmul %44, %45, %cst_33 {dimension_numbers = #tpu.dot_dimension_numbers<[1], [0], [0], [1], [0, 0, 1, 1], [], []>} : vector<2x128xbf16>, vector<128x128xbf16>, vector<2x128xf32> -> vector<2x128xf32>
      %c0_34 = arith.constant 0 : index
      %c0_35 = arith.constant 0 : index
      %47 = vector.load %arg10[%c0_34, %c0_35] : memref<1x128xf32, #tpu.memory_space<vmem>>, vector<1x128xf32>
      %48 = vector.broadcast %47 : vector<1x128xf32> to vector<2x128xf32>
      %49 = arith.addf %46, %48 : vector<2x128xf32>
      %c0_36 = arith.constant 0 : index
      %c0_37 = arith.constant 0 : index
      %50 = vector.load %arg11[%c0_36, %c0_37] : memref<2x128xf32, #tpu.memory_space<vmem>>, vector<2x128xf32>
      tpu.vector_store %arg11[%c0_36, %c0_37], %49 {strides = array<i32>} : memref<2x128xf32, #tpu.memory_space<vmem>>, vector<2x128xf32>,
    } else {
    }
    return
  }
  func.func @transform_0(%arg0: i32, %arg1: i32) -> (i32, i32, i32) {
    %c0_i32 = arith.constant 0 : i32
    %c0_i32_0 = arith.constant 0 : i32
    return %arg0, %arg1, %c0_i32 : i32, i32, i32
  }
  func.func @transform_1(%arg0: i32, %arg1: i32) -> (i32, i32, i32) {
    %c0_i32 = arith.constant 0 : i32
    %c0_i32_0 = arith.constant 0 : i32
    return %arg0, %arg1, %c0_i32 : i32, i32, i32
  }
  func.func @transform_2(%arg0: i32, %arg1: i32) -> (i32, i32) {
    %c0_i32 = arith.constant 0 : i32
    %c0_i32_0 = arith.constant 0 : i32
    %c0_i32_1 = arith.constant 0 : i32
    return %c0_i32, %c0_i32_0 : i32, i32
  }
  func.func @transform_3(%arg0: i32, %arg1: i32) -> (i32, i32) {
    %c0_i32 = arith.constant 0 : i32
    %c0_i32_0 = arith.constant 0 : i32
    %c0_i32_1 = arith.constant 0 : i32
    return %c0_i32, %c0_i32_0 : i32, i32
  }
  func.func @transform_4(%arg0: i32, %arg1: i32) -> (i32, i32) {
    %c0_i32 = arith.constant 0 : i32
    %c0_i32_0 = arith.constant 0 : i32
    %c0_i32_1 = arith.constant 0 : i32
    return %c0_i32, %c0_i32_0 : i32, i32
  }
  func.func @transform_5(%arg0: i32, %arg1: i32) -> (i32, i32) {
    %c0_i32 = arith.constant 0 : i32
    %c0_i32_0 = arith.constant 0 : i32
    %c0_i32_1 = arith.constant 0 : i32
    return %c0_i32, %c0_i32_0 : i32, i32
  }
  func.func @transform_6(%arg0: i32, %arg1: i32) -> (i32, i32) {
    %c0_i32 = arith.constant 0 : i32
    %c0_i32_0 = arith.constant 0 : i32
    %c0_i32_1 = arith.constant 0 : i32
    return %c0_i32, %c0_i32_0 : i32, i32
  }
  func.func @transform_7(%arg0: i32, %arg1: i32) -> (i32, i32) {
    %c0_i32 = arith.constant 0 : i32
    %c0_i32_0 = arith.constant 0 : i32
    %c0_i32_1 = arith.constant 0 : i32
    return %c0_i32, %c0_i32_0 : i32, i32
  }
  func.func @transform_8(%arg0: i32, %arg1: i32) -> (i32, i32) {
    %c0_i32 = arith.constant 0 : i32
    %c0_i32_0 = arith.constant 0 : i32
    %c0_i32_1 = arith.constant 0 : i32
    return %c0_i32, %c0_i32_0 : i32, i32
  }
  func.func @transform_9(%arg0: i32, %arg1: i32) -> (i32, i32) {
    %c0_i32 = arith.constant 0 : i32
    %c0_i32_0 = arith.constant 0 : i32
    return %arg0, %c0_i32 : i32, i32
  }
}

</mosaic_0001>

<bundles_post_ra>
// kernel: tpu_custom_call.1
= control target key start
LH: loop header
LB: loop body
LE: loop exit
PB: predicated region body
PF: predicated region fallthrough
CT: control target
= control target key end

     0   :  { %14 = vsyncpa [#allocation4], 0  ;;  %s702_s0 = inlined_call_operand.vmem [shape: bf16[2,16,4], index: 0, kind: input, shape index: {}]   ;;  %s703_s1 = inlined_call_operand.vmem [shape: bf16[2,16,2], index: 1, kind: input, shape index: {}]   ;;  %s704_s2 = inlined_call_operand.vmem [shape: bf16[4,128], index: 2, kind: input, shape index: {}]   ;;  %s705_s3 = inlined_call_operand.vmem [shape: bf16[2,128], index: 3, kind: input, shape index: {}]   ;;  %s706_s4 = inlined_call_operand.vmem [shape: f32[1,128], index: 4, kind: input, shape index: {}]   ;;  %s707_s5 = inlined_call_operand.hbm [shape: bf16[128,128], index: 5, kind: input, shape index: {}]   ;;  %s708_s6 = inlined_call_operand.vmem [shape: f32[1,128], index: 6, kind: input, shape index: {}]   ;;  %s709_s7 = inlined_call_operand.hbm [shape: bf16[128,128], index: 7, kind: input, shape index: {}]   ;;  %s710_s8 = inlined_call_operand.vmem [shape: f32[1,128], index: 8, kind: input, shape index: {}]   ;;  %s711_s9 = inlined_call_operand.hbm [shape: f32[2,128], index: 9, kind: output, shape index: {}]  }
   0x1   :  { %15 = vsyncpa [#allocation7], 0 }
   0x2   :  { %16 = vsyncpa [#allocation5], 0  ;;  %s31_s11 = sshll.u32 %s707_s5, 4  ;;  %s606_s12 = smov [#allocation3]   ;;  %s32_s11 = int_to_ptr.hbm [resolvable:$true] %s31_s11 }
   0x3   :  { %s33_s13 = sshll.u32 %s606_s12, 4  ;;  %s46_s16 = sshll.u32 %s709_s7, 4  ;;  %s34_s13 = int_to_ptr.vmem [resolvable:$true] %s33_s13  ;;  %s47_s16 = int_to_ptr.hbm [resolvable:$true] %s46_s16 }
   0x4   :  { %s607_s17 = smov 64   ;;  %s608_s18 = smov 4  }
   0x5   :  { %39 = dma.hbm_to_vmem [thread:$0]  %s32_s11, 1024, %s34_s13, [#allocation4], %s607_s17, %s607_s17, %s608_s18  }
   0x6   :  { %s609_s19 = smov [#allocation6]  }
   0x7   :  { %s48_s20 = sshll.u32 %s609_s19, 4  ;;  %s49_s20 = int_to_ptr.vmem [resolvable:$true] %s48_s20 }
   0x8   :  { %54 = dma.hbm_to_vmem [thread:$0]  %s47_s16, 1024, %s49_s20, [#allocation7], %s607_s17, %s607_s17, %s608_s18  }
   0x9   :  { %600 = dma.done.wait [#allocation4], 1024  }
   0xa   :  { %601 = vsyncadd [#allocation4], 4294966272 }
   0xb   :  { %602 = dma.done.wait [#allocation7], 1024  }
   0xc   :  { %603 = vsyncadd [#allocation7], 4294966272  ;;  %vm98_vm0 = vcmask 1040384   ;;  %vm138_vm1 = vcmask 1041408   ;;  %v80_v0 = vld [vmem:[%s705_s3] sm:$0x1] }
   0xd   :  { %v79_v1 = vld [vmem:[%s704_s2] sm:$0x3]  ;;  %v100_v2 = vsel %vm98_vm0, %v80_v0, 0  ;;  %vm91_vm2 = vcmask 15360   ;;  %vm131_vm3 = vcmask 31744   ;;  %v501_v7 = vld [vmem:[#allocation3 + $0x30] sm:$0xff] }
   0xe   :  { %v140_v3 = vsel %vm138_vm1, %v79_v1, 0  ;;  %v493_v4 = vld [vmem:[%s703_s1] sm:$0xff]  ;;  %109 = vmatpush.bf16.msra.mxu0 %v100_v2  ;;  %v500_v8 = vld [vmem:[#allocation3 + $0x28] sm:$0xff]  ;;  %v497_v13 = vld [vmem:[#allocation3 + $0x10] sm:$0xff]  ;;  %v610_v39 = vmov 0.0   ;;  %vm296_vm4 = vcmask 1041409  }
   0xf   :  { %v491_v5 = vld [vmem:[%s702_s0] sm:$0xff]  ;;  %149 = vmatpush.bf16.msra.mxu1 %v140_v3  ;;  %v494_v10 = vld [vmem:[%s703_s1 + $0x8] sm:$0xff]  ;;  %70 = vst [vmem:[#allocation2] sm:$0x3] %v610_v39  ;;  %v509_v41 = vld [vmem:[#allocation6 + $0x30] sm:$0xff]  ;;  %s611_s10 = smov [#allocation8]  }
  0x10   :  { %v502_v6 = vld [vmem:[#allocation3 + $0x38] sm:$0xff]  ;;  %v499_v9 = vld [vmem:[#allocation3 + $0x20] sm:$0xff]  ;;  %v496_v14 = vld [vmem:[#allocation3 + $0x8] sm:$0xff]  ;;  %s394_s11 = sshll.u32 %s611_s10, 4  ;;  %s396_s14 = sshll.u32 %s711_s9, 4  ;;  %s395_s11 = int_to_ptr.vmem [resolvable:$true] %s394_s11  ;;  %s397_s14 = int_to_ptr.hbm [resolvable:$true] %s396_s14 }
  0x11   :  { %511 = vmatpush.bf16.msra.mxu2 %v502_v6  ;;  %415 = vmatmul.msk.bf16.vlgmr.msra.gmra.mxu0 %vm91_vm2, %v493_v4  ;;  %v492_v11 = vld [vmem:[%s702_s0 + $0x8] sm:$0xff]  ;;  %v498_v12 = vld [vmem:[#allocation3 + $0x18] sm:$0xff]  ;;  %v505_v49 = vld [vmem:[#allocation6 + $0x10] sm:$0xff] }
  0x12   :  { %243 = vmatpush.bf16.msrb.mxu0 %v502_v6  ;;  %425 = vmatmul.msk.bf16.vlgmr.msra.gmra.mxu1 %vm131_vm3, %v491_v5  ;;  %v495_v15 = vld [vmem:[#allocation3] sm:$0xff]  ;;  %v525_v19 = vld [vmem:[%s706_s4] ss:$0 sm:$0xff]  ;;  %v508_v42 = vld [vmem:[#allocation6 + $0x28] sm:$0xff] }
  0x13   :  { %v510_v40 = vld [vmem:[#allocation6 + $0x38] sm:$0xff]  ;;  %v507_v44 = vld [vmem:[#allocation6 + $0x20] sm:$0xff]  ;;  %v504_v50 = vld [vmem:[#allocation6 + $0x8] sm:$0xff] }
  0x14   :  { %375 = vmatpush.bf16.msra.mxu3 %v510_v40  ;;  %v526_v45 = vld [vmem:[%s708_s6] ss:$0 sm:$0xff]  ;;  %v503_v52 = vld [vmem:[#allocation6] sm:$0xff] }
  0x15   :  { %512 = vmatpush.bf16.msra.mxu2 %v501_v7  ;;  %v506_v46 = vld [vmem:[#allocation6 + $0x18] sm:$0xff] }
  0x16   :  { %244 = vmatpush.bf16.msrb.mxu0 %v501_v7  ;;  %v279_v4 = vld [vmem:[#allocation2] sm:$0x3] }
  0x18   :  { %376 = vmatpush.bf16.msra.mxu3 %v509_v41 }
  0x19   :  { %513 = vmatpush.bf16.msra.mxu2 %v500_v8 }
  0x1a   :  { %245 = vmatpush.bf16.msrb.mxu0 %v500_v8 }
  0x1c   :  { %377 = vmatpush.bf16.msra.mxu3 %v508_v42 }
  0x1d   :  { %514 = vmatpush.bf16.msra.mxu2 %v499_v9 }
  0x1e   :  { %246 = vmatpush.bf16.msrb.mxu0 %v499_v9 }
  0x20   :  { %378 = vmatpush.bf16.msra.mxu3 %v507_v44 }
  0x21   :  { %416 = vmatmul.msk.bf16.gmra.mxu0 %vm91_vm2, %v494_v10  ;;  %515 = vmatpush.bf16.msra.mxu2 %v498_v12 }
  0x22   :  { %426 = vmatmul.msk.bf16.gmra.mxu1 %vm131_vm3, %v492_v11  ;;  %247 = vmatpush.bf16.msrb.mxu0 %v498_v12  ;;  %v527_v11 = vld [vmem:[%s710_s8] ss:$0 sm:$0xff] }
  0x24   :  { %379 = vmatpush.bf16.msra.mxu3 %v506_v46 }
  0x25   :  { %516 = vmatpush.bf16.msra.mxu2 %v497_v13 }
  0x26   :  { %248 = vmatpush.bf16.msrb.mxu0 %v497_v13 }
  0x28   :  { %380 = vmatpush.bf16.msra.mxu3 %v505_v49 }
  0x29   :  { %517 = vmatpush.bf16.msra.mxu2 %v496_v14 }
  0x2a   :  { %249 = vmatpush.bf16.msrb.mxu0 %v496_v14 }
  0x2c   :  { %381 = vmatpush.bf16.msra.mxu3 %v504_v50 }
  0x2d   :  { %518 = vmatpush.bf16.msra.mxu2 %v495_v15 }
  0x2e   :  { %250 = vmatpush.bf16.msrb.mxu0 %v495_v15 }
  0x30   :  { %382 = vmatpush.bf16.msra.mxu3 %v503_v52 }
  0x8e   :  { %v111_v16 = vpop.f32.mrf.mxu0 }
  0x8f   :  { %v151_v17 = vpop.f32.mrf.mxu1 }
  0x90   :  { %v152_v18 = vadd.f32 %v151_v17, %v111_v16 }
  0x92   :  { %v165_v22 = vadd.f32 %v525_v19, %v152_v18 }
  0x94   :  { %v169_v25 = vmax.f32 %v165_v22, 0.0 }
  0x96   :  { %v113_v20 = vpop.f32.mrf.mxu0 }
  0x97   :  { %v153_v21 = vpop.f32.mrf.mxu1 }
  0x98   :  { %v154_v23 = vadd.f32 %v153_v21, %v113_v20 }
  0x9a   :  { %v166_v24 = vadd.f32 %v525_v19, %v154_v23 }
  0x9c   :  { %v170_v26 = vmax.f32 %v166_v24, 0.0 }
  0x9e   :  { %v173_v27 = vpack.c.bf16 %v170_v26, %v169_v25  ;;  %v116_v28 = vpop.f32.mrf.mxu0 }
  0x9f   :  { %v156_v29 = vpop.f32.mrf.mxu1 }
  0xa0   :  { %251 = vmatmul.bf16.vlgmr.msrb.gmra.mxu0 %v173_v27  ;;  %v157_v30 = vadd.f32 %v156_v29, %v116_v28 }
  0xa2   :  { %v167_v33 = vadd.f32 %v525_v19, %v157_v30 }
  0xa4   :  { %v171_v36 = vmax.f32 %v167_v33, 0.0 }
  0xa6   :  { %v118_v31 = vpop.f32.mrf.mxu0 }
  0xa7   :  { %v158_v32 = vpop.f32.mrf.mxu1 }
  0xa8   :  { %v159_v34 = vadd.f32 %v158_v32, %v118_v31 }
  0xaa   :  { %v168_v35 = vadd.f32 %v525_v19, %v159_v34 }
  0xac   :  { %v172_v37 = vmax.f32 %v168_v35, 0.0 }
  0xae   :  { %v174_v38 = vpack.c.bf16 %v172_v37, %v171_v36 }
  0xb0   :  { %256 = vmatmul.bf16.vlgmr.msra.gmra.mxu2 %v174_v38 }
 0x11d   :  { %v252_v43 = vpop.f32.mrf.mxu0 }
 0x11e   :  { %v253_v48 = vadd.f32 %v526_v45, %v252_v43 }
 0x120   :  { %v262_v51 = vmax.f32 %v253_v48, 0.0 }
 0x122   :  { %v281_v53 = vrot.slane %v262_v51, 4 }
 0x124   :  { %v282_v54 = vadd.f32 %v281_v53, %v262_v51 }
 0x125   :  { %v254_v47 = vpop.f32.mrf.mxu0 }
 0x126   :  { %v283_v57 = vrot.slane %v282_v54, 2 }
 0x128   :  { %v284_v60 = vadd.f32 %v283_v57, %v282_v54 }
 0x12a   :  { %v285_v0 = vrot.slane %v284_v60, 1 }
 0x12c   :  { %v286_v3 = vadd.f32 %v285_v0, %v284_v60 }
 0x133   :  { %v257_v55 = vpop.f32.mrf.mxu2 }
 0x134   :  { %v258_v56 = vadd.f32 %v526_v45, %v257_v55 }
 0x136   :  { %v264_v58 = vmax.f32 %v258_v56, 0.0 }
 0x138   :  { %v288_v59 = vrot.slane %v264_v58, 4 }
 0x13a   :  { %v289_v61 = vadd.f32 %v288_v59, %v264_v58 }
 0x13b   :  { %v259_v62 = vpop.f32.mrf.mxu2 }
 0x13c   :  { %v290_v63 = vrot.slane %v289_v61, 2 }
 0x13e   :  { %v291_v1 = vadd.f32 %v290_v63, %v289_v61 }
 0x140   :  { %v292_v2 = vrot.slane %v291_v1, 1 }
 0x142   :  { %v293_v5 = vadd.f32 %v292_v2, %v291_v1 }
 0x144   :  { %v297_v6 = vsel %vm296_vm4, %v293_v5, %v286_v3 }
 0x145   :  { %v299_v7 = vadd.f32 %v297_v6, %v279_v4 }
 0x147   :  { %300 = vst [vmem:[#allocation2] sm:$0x3] %v299_v7 }
 0x14e   :  { %v304_v8 = vld [vmem:[#allocation2] sm:$0x3] }
 0x14f   :  { %v305_v9 = vmul.f32 0.125, %v304_v8 }
 0x151   :  { %v306_v10 = vpack.c.bf16 %v305_v9, %v305_v9 }
 0x153   :  { %383 = vmatmul.bf16.vlgmr.msra.gmra.mxu3 %v306_v10 }
 0x1d6   :  { %v384_v12 = vpop.f32.mrf.mxu3 }
 0x1d7   :  { %v385_v13 = vadd.f32 %v527_v11, %v384_v12 }
 0x1d9   :  { %388 = vst [vmem:[#allocation8] sm:$0x3] %v385_v13 }
 0x1da   :  { %399 = dma.vmem_to_hbm [thread:$0]  %s395_s11, 32, %s397_s14, [#allocation5]  }
 0x1de   :  { %v386_v14 = vpop.f32.mrf.mxu3 }
 0x1df   :  { %604 = dma.done.wait [#allocation5], 32  }
 0x1e0   :  { %605 = vsyncadd [#allocation5], 4294967264 }
 0x1e1   :  { %404 = vsyncpa [#allocation4], 1 }
 0x1e2   :  { %405 = vsyncpa [#allocation7], 1 }
 0x1e3   :  { %406 = vsyncpa [#allocation5], 1 }

</bundles_post_ra>
